<compile_context>
chip_gen: v5e
topology: v5e:2x2
jax: 0.10.0
libtpu: 0.0.40
codegen_flags: <defaults>
</compile_context>

<pallas_src>
import functools

import jax
import jax.numpy as jnp
from jax import lax
from jax.experimental import pallas as pl
from jax.experimental.pallas import tpu as pltpu


def _round_up(x, m):
    return ((x + m - 1) // m) * m


def policy_normal_kernel(x_ref, w_ref, b_ref, out_ref, *, a_dim):
    """One fused matmul + bias; exp applied to the scale half of the lane-dense slab."""
    x = x_ref[...]
    # Single MXU matmul over the fused (loc | scale | pad) weight, f32 accumulation.
    y = jnp.dot(x, w_ref[...], preferred_element_type=jnp.float32) + b_ref[...]
    # Columns [0, a_dim)          -> loc  (identity)
    # Columns [a_dim, 2*a_dim)    -> scale logits -> exp   (EUP; pad columns exp(0)=1, discarded)
    col = lax.broadcasted_iota(jnp.int32, y.shape, dimension=1)
    out_ref[...] = jnp.where(col < a_dim, y, jnp.exp(y)).astype(out_ref.dtype)


def pack_policy_normal_params(w_loc, b_loc, w_scale, b_scale, matmul_dtype=jnp.float32):
    """One-time fusion of the two Linear heads into a lane-dense padded weight/bias.

    w_loc, w_scale: (a_dim, s_dim)  (PyTorch nn.Linear weight layout)
    b_loc, b_scale: (a_dim,)
    Returns (w_fused (s_dim, n_pad), b_fused (1, n_pad), a_dim, n_pad) with n_pad % 128 == 0.
    """
    a_dim, s_dim = w_loc.shape
    n_out = 2 * a_dim
    n_pad = max(128, _round_up(n_out, 128))

    w = jnp.concatenate(
        [jnp.asarray(w_loc, jnp.float32).T, jnp.asarray(w_scale, jnp.float32).T], axis=1
    )  # (s_dim, 2*a_dim)
    w = jnp.pad(w, ((0, 0), (0, n_pad - n_out))).astype(matmul_dtype)

    b = jnp.concatenate(
        [jnp.asarray(b_loc, jnp.float32), jnp.asarray(b_scale, jnp.float32)]
    ).reshape(1, n_out)
    b = jnp.pad(b, ((0, 0), (0, n_pad - n_out))).astype(jnp.float32)  # bias add stays f32
    return w, b, a_dim, n_pad


def policy_normal_packed(x, w_fused, b_fused, a_dim, n_pad, *, block_b=512):
    """Runs the fused kernel on pre-packed params. Returns (loc, scale)."""
    B, s_dim = x.shape
    matmul_dtype = w_fused.dtype

    # Row tile: >= 8 (sublane), target `block_b` rows; pad B up to a multiple of the tile.
    tb = block_b if B >= block_b else _round_up(B, 8)
    b_pad = _round_up(B, tb)

    x_p = x.astype(matmul_dtype)
    if b_pad != B:
        x_p = jnp.pad(x_p, ((0, b_pad - B), (0, 0)))

    itemsize = jnp.dtype(matmul_dtype).itemsize
    cost = pl.CostEstimate(
        flops=2 * b_pad * s_dim * n_pad,
        transcendentals=b_pad * n_pad,
        bytes_accessed=(x_p.size * itemsize
                        + w_fused.size * itemsize
                        + b_fused.size * 4
                        + b_pad * n_pad * 4),
    )

    out = pl.pallas_call(
        functools.partial(policy_normal_kernel, a_dim=a_dim),
        out_shape=jax.ShapeDtypeStruct((b_pad, n_pad), jnp.float32),
        grid=(b_pad // tb,),
        in_specs=[
            pl.BlockSpec((tb, s_dim), lambda i: (i, 0)),      # x: tiled over rows
            pl.BlockSpec((s_dim, n_pad), lambda i: (0, 0)),   # fused weight: VMEM-resident
            pl.BlockSpec((1, n_pad), lambda i: (0, 0)),       # fused bias:  VMEM-resident
        ],
        out_specs=pl.BlockSpec((tb, n_pad), lambda i: (i, 0)),  # lane-dense (128-mult) stores
        compiler_params=pltpu.CompilerParams(
            dimension_semantics=("parallel",),                # v7x: shard rows across 2 TCs
        ),
        cost_estimate=cost,
    )(x_p, w_fused, b_fused)

    loc = out[:B, :a_dim]
    scale = out[:B, a_dim:2 * a_dim]
    return loc, scale


def policy_normal(x, w_loc, b_loc, w_scale, b_scale, *,
                  matmul_dtype=jnp.float32, block_b=512):
    """Convenience wrapper: packs params then runs the fused kernel.

    In a real rollout loop, call `pack_policy_normal_params` once at init and reuse
    `policy_normal_packed` so the transpose/concat/pad is not paid per step.
    """
    w_fused, b_fused, a_dim, n_pad = pack_policy_normal_params(
        w_loc, b_loc, w_scale, b_scale, matmul_dtype=matmul_dtype)
    return policy_normal_packed(x, w_fused, b_fused, a_dim, n_pad, block_b=block_b)


def _torch_linear_init(key, out_features, in_features):
    """Deterministic init matching nn.Linear defaults: U(-1/sqrt(in), 1/sqrt(in))."""
    kw, kb = jax.random.split(key)
    bound = 1.0 / jnp.sqrt(jnp.float32(in_features))
    w = jax.random.uniform(kw, (out_features, in_features), jnp.float32,
                           minval=-bound, maxval=bound)
    b = jax.random.uniform(kb, (out_features,), jnp.float32,
                           minval=-bound, maxval=bound)
    return w, b


if __name__ == "__main__":
    # TODO(synk): torch.distributions.normal.Normal itself is not a tensor op; the kernel
    # returns its parameters (loc, scale) which fully determine the distribution.
    B, s_dim, a_dim = 8, 32, 16

    key = jax.random.PRNGKey(0)
    k_x, k_loc, k_scale = jax.random.split(key, 3)

    x = jax.random.normal(k_x, (B, s_dim), jnp.float32)
    w_loc, b_loc = _torch_linear_init(k_loc, a_dim, s_dim)
    w_scale, b_scale = _torch_linear_init(k_scale, a_dim, s_dim)

    # Plain-JAX reference.
    loc_ref = x @ w_loc.T + b_loc
    scale_ref = jnp.exp(x @ w_scale.T + b_scale)

    # f32 matmul path: must match the reference tightly.
    loc, scale = policy_normal(x, w_loc, b_loc, w_scale, b_scale,
                               matmul_dtype=jnp.float32)
    jax.block_until_ready((loc, scale))
    assert loc.shape == (B, a_dim) and scale.shape == (B, a_dim)
    assert jnp.allclose(loc, loc_ref, atol=1e-5, rtol=1e-5)
    assert jnp.allclose(scale, scale_ref, atol=1e-5, rtol=1e-5)
    assert bool(jnp.all(scale > 0))  # valid Normal scale

    # bf16 matmul-operand path (HBM-bound regime optimization): looser tolerance.
    loc16, scale16 = policy_normal(x, w_loc, b_loc, w_scale, b_scale,
                                   matmul_dtype=jnp.bfloat16)
    jax.block_until_ready((loc16, scale16))
    assert jnp.allclose(loc16, loc_ref, atol=5e-2, rtol=5e-2)
    assert jnp.allclose(scale16, scale_ref, atol=5e-2, rtol=5e-2)
    assert bool(jnp.all(scale16 > 0))

    print("KERNEL_OK")
</pallas_src>

<mosaic_0001>
module attributes {stable_mosaic.version = 11 : i64} {
  func.func @policy_normal_kernel(%arg0: i32, %arg1: memref<8x32xf32, #tpu.memory_space<vmem>>, %arg2: memref<32x128xf32, #tpu.memory_space<vmem>>, %arg3: memref<1x128xf32, #tpu.memory_space<vmem>>, %arg4: memref<8x128xf32, #tpu.memory_space<vmem>>) attributes {dimension_semantics = [#tpu.dimension_semantics<parallel>], iteration_bounds = array<i64: 1>, scalar_prefetch = 0 : i64, scratch_operands = 0 : i64, tpu.core_type = #tpu.core_type<tc>, window_params = [{transform_indices = @transform_0, window_bounds = array<i64: 8, 32>}, {pipeline_mode = #tpu.pipeline_mode<synchronous>, transform_indices = @transform_1, window_bounds = array<i64: 32, 128>}, {pipeline_mode = #tpu.pipeline_mode<synchronous>, transform_indices = @transform_2, window_bounds = array<i64: 1, 128>}, {transform_indices = @transform_3, window_bounds = array<i64: 8, 128>}]} {
    %c0 = arith.constant 0 : index
    %c0_0 = arith.constant 0 : index
    %0 = vector.load %arg1[%c0, %c0_0] : memref<8x32xf32, #tpu.memory_space<vmem>>, vector<8x32xf32>
    %c0_1 = arith.constant 0 : index
    %c0_2 = arith.constant 0 : index
    %1 = vector.load %arg2[%c0_1, %c0_2] : memref<32x128xf32, #tpu.memory_space<vmem>>, vector<32x128xf32>
    %cst = arith.constant dense<0.000000e+00> : vector<8x128xf32>
    %2 = tpu.matmul %0, %1, %cst {dimension_numbers = #tpu.dot_dimension_numbers<[1], [0], [0], [1], [0, 0, 1, 1], [], []>} : vector<8x32xf32>, vector<32x128xf32>, vector<8x128xf32> -> vector<8x128xf32>
    %c0_3 = arith.constant 0 : index
    %c0_4 = arith.constant 0 : index
    %3 = vector.load %arg3[%c0_3, %c0_4] : memref<1x128xf32, #tpu.memory_space<vmem>>, vector<1x128xf32>
    %4 = vector.broadcast %3 : vector<1x128xf32> to vector<8x128xf32>
    %5 = arith.addf %2, %4 : vector<8x128xf32>
    %6 = tpu.iota {dimensions = array<i32: 1>} : vector<8x128xi32>
    %c16_i32 = arith.constant 16 : i32
    %7 = vector.broadcast %c16_i32 : i32 to vector<8x128xi32>
    %8 = arith.cmpi slt, %6, %7 : vector<8x128xi32>
    %9 = math.exp %5 : vector<8x128xf32>
    %10 = arith.select %8, %5, %9 : vector<8x128xi1>, vector<8x128xf32>
    %c0_5 = arith.constant 0 : index
    %c0_6 = arith.constant 0 : index
    %11 = vector.load %arg4[%c0_5, %c0_6] : memref<8x128xf32, #tpu.memory_space<vmem>>, vector<8x128xf32>
    tpu.vector_store %arg4[%c0_5, %c0_6], %10 {strides = array<i32>} : memref<8x128xf32, #tpu.memory_space<vmem>>, vector<8x128xf32>,
    return
  }
  func.func @transform_0(%arg0: i32) -> (i32, i32) {
    %c0_i32 = arith.constant 0 : i32
    %c0_i32_0 = arith.constant 0 : i32
    return %arg0, %c0_i32 : i32, i32
  }
  func.func @transform_1(%arg0: i32) -> (i32, i32) {
    %c0_i32 = arith.constant 0 : i32
    %c0_i32_0 = arith.constant 0 : i32
    %c0_i32_1 = arith.constant 0 : i32
    return %c0_i32, %c0_i32_0 : i32, i32
  }
  func.func @transform_2(%arg0: i32) -> (i32, i32) {
    %c0_i32 = arith.constant 0 : i32
    %c0_i32_0 = arith.constant 0 : i32
    %c0_i32_1 = arith.constant 0 : i32
    return %c0_i32, %c0_i32_0 : i32, i32
  }
  func.func @transform_3(%arg0: i32) -> (i32, i32) {
    %c0_i32 = arith.constant 0 : i32
    %c0_i32_0 = arith.constant 0 : i32
    return %arg0, %c0_i32 : i32, i32
  }
}

</mosaic_0001>

<bundles_post_ra>
// kernel: tpu_custom_call.1
= control target key start
LH: loop header
LB: loop body
LE: loop exit
PB: predicated region body
PF: predicated region fallthrough
CT: control target
= control target key end

     0   :  { %8 = vsyncpa [#allocation3], 0  ;;  %s227_s0 = inlined_call_operand.hbm [shape: f32[8,32], index: 0, kind: input, shape index: {}]   ;;  %s228_s1 = inlined_call_operand.hbm [shape: f32[32,128], index: 1, kind: input, shape index: {}]   ;;  %s229_s2 = inlined_call_operand.vmem [shape: f32[1,128], index: 2, kind: input, shape index: {}]   ;;  %s230_s3 = inlined_call_operand.hbm [shape: f32[8,128], index: 3, kind: output, shape index: {}]  }
   0x1   :  { %9 = vsyncpa [#allocation6], 0 }
   0x2   :  { %10 = vsyncpa [#allocation4], 0  ;;  %s16_s14 = sshll.u32 %s227_s0, 4  ;;  %s190_s15 = smov [#allocation2]   ;;  %s17_s14 = int_to_ptr.hbm [resolvable:$true] %s16_s14 }
   0x3   :  { %s18_s16 = sshll.u32 %s190_s15, 4  ;;  %s26_s19 = sshll.u32 %s228_s1, 4  ;;  %s19_s16 = int_to_ptr.vmem [resolvable:$true] %s18_s16  ;;  %s27_s19 = int_to_ptr.hbm [resolvable:$true] %s26_s19 }
   0x4   :  { %21 = dma.hbm_to_vmem [thread:$0]  %s17_s14, 128, %s19_s16, [#allocation3]  }
   0x5   :  { %s191_s20 = smov [#allocation5]   ;;  %s192_s22 = smov 128  }
   0x6   :  { %s28_s21 = sshll.u32 %s191_s20, 4  ;;  %s193_s23 = smov 8   ;;  %s29_s21 = int_to_ptr.vmem [resolvable:$true] %s28_s21 }
   0x7   :  { %34 = dma.hbm_to_vmem [thread:$0]  %s27_s19, 512, %s29_s21, [#allocation6], %s192_s22, %s192_s22, %s193_s23  }
   0x8   :  { %184 = dma.done.wait [#allocation3], 128  }
   0x9   :  { %185 = vsyncadd [#allocation3], 4294967168 }
   0xa   :  { %186 = dma.done.wait [#allocation6], 512  }
   0xb   :  { %187 = vsyncadd [#allocation6], 4294966784  ;;  %v49_v0 = vld [vmem:[#allocation5 + $0x18] sm:$0xff]  ;;  %v48_v1 = vld [vmem:[#allocation5 + $0x10] sm:$0xff]  ;;  %vm54_vm0 = vcmask 261120   ;;  %v78_v8 = vlaneseq  ;;  %s194_s24 = smov [#allocation7]  }
   0xc   :  { %70 = vmatpush.msra.mxu0 %v49_v0  ;;  %v47_v2 = vld [vmem:[#allocation5 + $0x8] sm:$0xff]  ;;  %v46_v3 = vld [vmem:[#allocation5] sm:$0xff]  ;;  %v45_v4 = vld [vmem:[#allocation2] sm:$0xff]  ;;  %s90_s25 = sshll.u32 %s194_s24, 4  ;;  %s92_s28 = sshll.u32 %s230_s3, 4  ;;  %s91_s25 = int_to_ptr.vmem [resolvable:$true] %s90_s25  ;;  %s93_s28 = int_to_ptr.hbm [resolvable:$true] %s92_s28 }
   0xd   :  { %v109_v5 = vld [vmem:[%s229_s2] ss:$0 sm:$0xff]  ;;  %v79_v10 = vand.u32 127, %v78_v8 }
   0xe   :  { %71 = vmatpush.msra.mxu0 %v48_v1 }
   0xf   :  { %vm80_vm1 = vcmp.lt.s32.totalorder %v79_v10, 16 }
  0x10   :  { %72 = vmatpush.msra.mxu0 %v47_v2 }
  0x12   :  { %73 = vmatpush.msra.mxu0 %v46_v3 }
  0x13   :  { %103 = vmatmul.msk.f32.vlgmr.msra.gmra.mxu0 %vm54_vm0, %v45_v4 }
  0x90   :  { %v75_v6 = vpop.f32.mrf.mxu0 }
  0x91   :  { %v76_v7 = vadd.f32 %v109_v5, %v75_v6 }
  0x93   :  { %v81_v9 = vmul.f32 1.442695, %v76_v7 }
  0x95   :  { %110 = vpow2.f32 %v81_v9 }
  0x9b   :  { %v111_v11 = vpop.eup %110 }
  0x9c   :  { %v83_v12 = vsel %vm80_vm1, %v76_v7, %v111_v11 }
  0x9d   :  { %84 = vst [vmem:[#allocation7] sm:$0xff] %v83_v12 }
  0x9e   :  { %95 = dma.vmem_to_hbm [thread:$0]  %s91_s25, 128, %s93_s28, [#allocation4]  }
  0x9f   :  { %188 = dma.done.wait [#allocation4], 128  }
  0xa0   :  { %189 = vsyncadd [#allocation4], 4294967168 }
  0xa1   :  { %100 = vsyncpa [#allocation3], 1 }
  0xa2   :  { %101 = vsyncpa [#allocation6], 1 }
  0xa3   :  { %102 = vsyncpa [#allocation4], 1 }

</bundles_post_ra>
